<compile_context>
chip_gen: v6e
topology: v6e:2x2x1
jax: 0.10.0
libtpu: 0.0.40
codegen_flags: <defaults>
</compile_context>

<pallas_src>
import jax
import jax.numpy as jnp
from jax.experimental import pallas as pl
from jax.experimental.pallas import tpu as pltpu


_LANE = 128
_SUBLANE = 8
# Below this element count, launch + pipeline overhead dwarfs the work; plain
# XLA floor is strictly faster.
_SMALL_INPUT_THRESHOLD = 64 * 1024
# ~2 MiB per block -> 2(in) + 2(out) double buffers = ~8 MiB, safely under the
# 16 MiB scoped-VMEM default on v5e (32 MiB on v6e/v7x), yet large enough to
# amortize the ~0.35 us/grid-step overhead on all generations (incl. v7x).
_TARGET_BLOCK_BYTES = 2 * 1024 * 1024


def _ste_floor_kernel(x_ref, o_ref):
    # Hot path: elementwise floor over the whole VMEM tile (VPU).
    o_ref[...] = jnp.floor(x_ref[...])


def _pick_lane_width(n_padded):
    # Widest lane dimension (multiple of 128, capped at 4096) dividing the
    # flat size -> fewer, longer unmasked vector stores and longer DMAs.
    for w in (4096, 2048, 1024, 512, 256, 128):
        if n_padded % w == 0:
            return w
    return _LANE


def _ste_floor_2d(x2d):
    """x2d: (R, W) array, W a multiple of 128. Tiled over rows."""
    R, W = x2d.shape
    itemsize = jnp.dtype(x2d.dtype).itemsize

    # Row tile sized for ~_TARGET_BLOCK_BYTES per block; multiple of 8
    # (sublane) or the full row extent.
    tr = max(_SUBLANE, _TARGET_BLOCK_BYTES // (W * itemsize))
    tr = (tr // _SUBLANE) * _SUBLANE
    if tr >= R:
        tr = R  # full extent is always a legal block dim

    grid = (pl.cdiv(R, tr),)
    n_bytes = R * W * itemsize

    return pl.pallas_call(
        _ste_floor_kernel,
        out_shape=jax.ShapeDtypeStruct((R, W), x2d.dtype),
        grid_spec=pltpu.PrefetchScalarGridSpec(
            num_scalar_prefetch=0,
            grid=grid,
            in_specs=[pl.BlockSpec((tr, W), lambda i: (i, 0))],
            out_specs=pl.BlockSpec((tr, W), lambda i: (i, 0)),
        ),
        compiler_params=pltpu.CompilerParams(
            # Single grid axis is independent -> shards across the 2 TCs on v7x.
            dimension_semantics=("parallel",)),
        cost_estimate=pl.CostEstimate(
            flops=R * W, transcendentals=0, bytes_accessed=2 * n_bytes),
    )(x2d)


@jax.custom_vjp
def ste_floor(x):
    """StraightThroughEstimator_WB forward: floor(x); identity gradient."""
    orig_shape = x.shape
    n = x.size
    if n == 0:
        return x
    if n < _SMALL_INPUT_THRESHOLD:
        # Tiny tensors: skip the kernel launch entirely.
        return jnp.floor(x)

    xf = jnp.ravel(x)
    pad = (-n) % _LANE
    if pad:
        # Only pad to a multiple of 128 (lane width), and only when needed;
        # Pallas handles a ragged last row-block via pl.cdiv.
        xf = jnp.pad(xf, (0, pad))
    n_padded = n + pad

    W = _pick_lane_width(n_padded)
    x2d = xf.reshape(n_padded // W, W)  # free row-major bitcast
    y2d = _ste_floor_2d(x2d)

    yf = y2d.reshape(-1)
    if pad:
        yf = yf[:n]  # only emitted when padding was actually added
    return yf.reshape(orig_shape)


def _ste_fwd(x):
    return ste_floor(x), None


def _ste_bwd(_, g):
    # Straight-through estimator: pass the gradient unchanged.
    return (g,)


ste_floor.defvjp(_ste_fwd, _ste_bwd)


if __name__ == "__main__":
    key = jax.random.PRNGKey(0)
    k1, k2 = jax.random.split(key)

    # Small NCHW input consistent with the module spec (takes the fast path).
    x_small = jax.random.normal(k1, (2, 4, 16, 16), dtype=jnp.float32) * 3.0
    y_small = jax.block_until_ready(ste_floor(x_small))
    assert y_small.shape == x_small.shape and y_small.dtype == x_small.dtype
    assert bool(jnp.all(y_small == jnp.floor(x_small)))

    # Larger input that exercises the Pallas kernel path (>= 64K elements).
    x_big = jax.random.normal(k2, (4, 8, 64, 64), dtype=jnp.float32) * 5.0
    y_big = jax.block_until_ready(ste_floor(x_big))
    assert y_big.shape == x_big.shape and y_big.dtype == x_big.dtype
    assert bool(jnp.all(y_big == jnp.floor(x_big)))

    # Straight-through gradient: identity on both paths.
    g_small = jax.grad(lambda t: jnp.sum(ste_floor(t)))(x_small)
    g_big = jax.grad(lambda t: jnp.sum(ste_floor(t)))(x_big)
    jax.block_until_ready((g_small, g_big))
    assert bool(jnp.all(g_small == 1.0))
    assert bool(jnp.all(g_big == 1.0))

    print("KERNEL_OK")
</pallas_src>

<mosaic_0001>
module attributes {stable_mosaic.version = 11 : i64} {
  func.func @_ste_floor_kernel(%arg0: i32, %arg1: memref<32x4096xf32, #tpu.memory_space<vmem>>, %arg2: memref<32x4096xf32, #tpu.memory_space<vmem>>) attributes {dimension_semantics = [#tpu.dimension_semantics<parallel>], iteration_bounds = array<i64: 1>, scalar_prefetch = 0 : i64, scratch_operands = 0 : i64, tpu.core_type = #tpu.core_type<tc>, window_params = [{transform_indices = @transform_0, window_bounds = array<i64: 32, 4096>}, {transform_indices = @transform_1, window_bounds = array<i64: 32, 4096>}]} {
    %c0 = arith.constant 0 : index
    %c0_0 = arith.constant 0 : index
    %0 = vector.load %arg1[%c0, %c0_0] : memref<32x4096xf32, #tpu.memory_space<vmem>>, vector<32x4096xf32>
    %1 = math.floor %0 : vector<32x4096xf32>
    %c0_1 = arith.constant 0 : index
    %c0_2 = arith.constant 0 : index
    %2 = vector.load %arg2[%c0_1, %c0_2] : memref<32x4096xf32, #tpu.memory_space<vmem>>, vector<32x4096xf32>
    tpu.vector_store %arg2[%c0_1, %c0_2], %1 {strides = array<i32>} : memref<32x4096xf32, #tpu.memory_space<vmem>>, vector<32x4096xf32>,
    return
  }
  func.func @transform_0(%arg0: i32) -> (i32, i32) {
    %c0_i32 = arith.constant 0 : i32
    %c0_i32_0 = arith.constant 0 : i32
    return %arg0, %c0_i32 : i32, i32
  }
  func.func @transform_1(%arg0: i32) -> (i32, i32) {
    %c0_i32 = arith.constant 0 : i32
    %c0_i32_0 = arith.constant 0 : i32
    return %arg0, %c0_i32 : i32, i32
  }
}

</mosaic_0001>

<bundles_post_ra>
// kernel: tpu_custom_call.1
= control target key start
LH: loop header
LB: loop body
LE: loop exit
PB: predicated region body
PF: predicated region fallthrough
CT: control target
= control target key end

     0   :  { %6 = vsyncpa [#allocation3], 0  ;;  %s498_s0 = inlined_call_operand.hbm [shape: f32[32,4096], index: 0, kind: input, shape index: {}]   ;;  %s499_s1 = inlined_call_operand.hbm [shape: f32[32,4096], index: 1, kind: output, shape index: {}]  }
   0x1   :  { %7 = vsyncpa [#allocation4], 0  ;;  %s472_s6 = smov [#allocation2]  }
   0x2   :  { %s13_s7 = sshll.u32 %s472_s6, 4  ;;  %s14_s7 = int_to_ptr.vmem [resolvable:$true] %s13_s7 }
   0x3   :  { %s436_s8 = scalar_lea.vmem %s14_s7, 16384  ;;  %p441_p1 = scmp.lt.s32.totalorder %s14_s7, %s14_s7 }
   0x4   :  { %p437_p0 = scmp.ne.s32.totalorder %s14_s7, %s436_s8  ;;  %p442_p2 = scmp.lt.s32.totalorder %s436_s8, %s436_s8 }
   0x6   :  { %p443_p3 = por %p442_p2, %p441_p1 }
   0x8   :  { %p444_p4 = pnand %p443_p3, %p437_p0 }
   0xa   :  { %447 = shalt.err (!%p444_p4)
}
   0xb   :  { %s473_s9 = smov 4096   ;;  %s474_s10 = smov 256  }
   0xc   :  { %19 = dma.hbm_to_vmem [thread:$0]  %s498_s0, 16384, %s14_s7, [#allocation3], %s473_s9, %s473_s9, %s474_s10  }
   0xd   :  { %468 = dma.done.wait [#allocation3], 16384  }
   0xe   :  { %469 = vsyncadd [#allocation3], 4294950912  ;;  %v23_v0 = vld [vmem:[#allocation2] sm:$0xff]  ;;  %v24_v1 = vld [vmem:[#allocation2 + $0x8] sm:$0xff]  ;;  %s475_s0 = smov [#allocation5]  }
   0xf   :  { %v25_v2 = vld [vmem:[#allocation2 + $0x10] sm:$0xff]  ;;  %v151_v3 = vfloor.f32 %v23_v0  ;;  %v152_v4 = vfloor.f32 %v24_v1  ;;  %v26_v6 = vld [vmem:[#allocation2 + $0x18] sm:$0xff]  ;;  %v27_v7 = vld [vmem:[#allocation2 + $0x20] sm:$0xff]  ;;  %s412_s13 = sshll.u32 %s475_s0, 4  ;;  %s413_s13 = int_to_ptr.vmem [resolvable:$true] %s412_s13 }
  0x10   :  { %v153_v5 = vfloor.f32 %v25_v2  ;;  %v28_v8 = vld [vmem:[#allocation2 + $0x28] sm:$0xff]  ;;  %v154_v9 = vfloor.f32 %v26_v6  ;;  %v155_v10 = vfloor.f32 %v27_v7  ;;  %v29_v12 = vld [vmem:[#allocation2 + $0x30] sm:$0xff]  ;;  %v30_v13 = vld [vmem:[#allocation2 + $0x38] sm:$0xff]  ;;  %s448_s14 = scalar_lea.vmem %s413_s13, 16384  ;;  %p453_p6 = scmp.lt.s32.totalorder %s413_s13, %s413_s13 }
  0x11   :  { %v156_v11 = vfloor.f32 %v28_v8  ;;  %v31_v14 = vld [vmem:[#allocation2 + $0x40] sm:$0xff]  ;;  %279 = vst [vmem:[#allocation5] sm:$0xff] %v151_v3  ;;  %280 = vst [vmem:[#allocation5 + $0x8] sm:$0xff] %v152_v4  ;;  %v157_v15 = vfloor.f32 %v29_v12  ;;  %v158_v16 = vfloor.f32 %v30_v13  ;;  %v32_v18 = vld [vmem:[#allocation2 + $0x48] sm:$0xff]  ;;  %p449_p5 = scmp.ne.s32.totalorder %s413_s13, %s448_s14  ;;  %p454_p7 = scmp.lt.s32.totalorder %s448_s14, %s448_s14 }
  0x12   :  { %281 = vst [vmem:[#allocation5 + $0x10] sm:$0xff] %v153_v5  ;;  %v159_v17 = vfloor.f32 %v31_v14  ;;  %v33_v19 = vld [vmem:[#allocation2 + $0x50] sm:$0xff]  ;;  %v34_v20 = vld [vmem:[#allocation2 + $0x58] sm:$0xff]  ;;  %282 = vst [vmem:[#allocation5 + $0x18] sm:$0xff] %v154_v9  ;;  %v160_v21 = vfloor.f32 %v32_v18 }
  0x13   :  { %283 = vst [vmem:[#allocation5 + $0x20] sm:$0xff] %v155_v10  ;;  %284 = vst [vmem:[#allocation5 + $0x28] sm:$0xff] %v156_v11  ;;  %v161_v22 = vfloor.f32 %v33_v19  ;;  %v162_v23 = vfloor.f32 %v34_v20  ;;  %v35_v24 = vld [vmem:[#allocation2 + $0x60] sm:$0xff]  ;;  %v36_v25 = vld [vmem:[#allocation2 + $0x68] sm:$0xff]  ;;  %p455_p8 = por %p454_p7, %p453_p6 }
  0x14   :  { %v37_v26 = vld [vmem:[#allocation2 + $0x70] sm:$0xff]  ;;  %285 = vst [vmem:[#allocation5 + $0x30] sm:$0xff] %v157_v15  ;;  %286 = vst [vmem:[#allocation5 + $0x38] sm:$0xff] %v158_v16  ;;  %v163_v27 = vfloor.f32 %v35_v24  ;;  %v164_v28 = vfloor.f32 %v36_v25  ;;  %v38_v30 = vld [vmem:[#allocation2 + $0x78] sm:$0xff] }
  0x15   :  { %287 = vst [vmem:[#allocation5 + $0x40] sm:$0xff] %v159_v17  ;;  %v165_v29 = vfloor.f32 %v37_v26  ;;  %v39_v31 = vld [vmem:[#allocation2 + $0x80] sm:$0xff]  ;;  %v40_v32 = vld [vmem:[#allocation2 + $0x88] sm:$0xff]  ;;  %288 = vst [vmem:[#allocation5 + $0x48] sm:$0xff] %v160_v21  ;;  %v166_v33 = vfloor.f32 %v38_v30  ;;  %p456_p9 = pnand %p455_p8, %p449_p5 }
  0x16   :  { %289 = vst [vmem:[#allocation5 + $0x50] sm:$0xff] %v161_v22  ;;  %290 = vst [vmem:[#allocation5 + $0x58] sm:$0xff] %v162_v23  ;;  %v167_v34 = vfloor.f32 %v39_v31  ;;  %v168_v35 = vfloor.f32 %v40_v32  ;;  %v41_v36 = vld [vmem:[#allocation2 + $0x90] sm:$0xff]  ;;  %v42_v37 = vld [vmem:[#allocation2 + $0x98] sm:$0xff] }
  0x17   :  { %v43_v38 = vld [vmem:[#allocation2 + $0xa0] sm:$0xff]  ;;  %291 = vst [vmem:[#allocation5 + $0x60] sm:$0xff] %v163_v27  ;;  %292 = vst [vmem:[#allocation5 + $0x68] sm:$0xff] %v164_v28  ;;  %v169_v39 = vfloor.f32 %v41_v36  ;;  %v170_v40 = vfloor.f32 %v42_v37  ;;  %v44_v42 = vld [vmem:[#allocation2 + $0xa8] sm:$0xff] }
  0x18   :  { %293 = vst [vmem:[#allocation5 + $0x70] sm:$0xff] %v165_v29  ;;  %v171_v41 = vfloor.f32 %v43_v38  ;;  %v45_v43 = vld [vmem:[#allocation2 + $0xb0] sm:$0xff]  ;;  %v46_v44 = vld [vmem:[#allocation2 + $0xb8] sm:$0xff]  ;;  %294 = vst [vmem:[#allocation5 + $0x78] sm:$0xff] %v166_v33  ;;  %v172_v45 = vfloor.f32 %v44_v42 }
  0x19   :  { %295 = vst [vmem:[#allocation5 + $0x80] sm:$0xff] %v167_v34  ;;  %296 = vst [vmem:[#allocation5 + $0x88] sm:$0xff] %v168_v35  ;;  %v173_v46 = vfloor.f32 %v45_v43  ;;  %v174_v47 = vfloor.f32 %v46_v44  ;;  %v47_v48 = vld [vmem:[#allocation2 + $0xc0] sm:$0xff]  ;;  %v48_v49 = vld [vmem:[#allocation2 + $0xc8] sm:$0xff] }
  0x1a   :  { %v49_v50 = vld [vmem:[#allocation2 + $0xd0] sm:$0xff]  ;;  %297 = vst [vmem:[#allocation5 + $0x90] sm:$0xff] %v169_v39  ;;  %298 = vst [vmem:[#allocation5 + $0x98] sm:$0xff] %v170_v40  ;;  %v175_v51 = vfloor.f32 %v47_v48  ;;  %v176_v52 = vfloor.f32 %v48_v49  ;;  %v50_v54 = vld [vmem:[#allocation2 + $0xd8] sm:$0xff] }
  0x1b   :  { %299 = vst [vmem:[#allocation5 + $0xa0] sm:$0xff] %v171_v41  ;;  %v177_v53 = vfloor.f32 %v49_v50  ;;  %v51_v55 = vld [vmem:[#allocation2 + $0xe0] sm:$0xff]  ;;  %v52_v56 = vld [vmem:[#allocation2 + $0xe8] sm:$0xff]  ;;  %300 = vst [vmem:[#allocation5 + $0xa8] sm:$0xff] %v172_v45  ;;  %v178_v57 = vfloor.f32 %v50_v54 }
  0x1c   :  { %301 = vst [vmem:[#allocation5 + $0xb0] sm:$0xff] %v173_v46  ;;  %302 = vst [vmem:[#allocation5 + $0xb8] sm:$0xff] %v174_v47  ;;  %v179_v58 = vfloor.f32 %v51_v55  ;;  %v180_v59 = vfloor.f32 %v52_v56  ;;  %v53_v60 = vld [vmem:[#allocation2 + $0xf0] sm:$0xff]  ;;  %v54_v61 = vld [vmem:[#allocation2 + $0xf8] sm:$0xff] }
  0x1d   :  { %v55_v62 = vld [vmem:[#allocation2 + $0x100] sm:$0xff]  ;;  %303 = vst [vmem:[#allocation5 + $0xc0] sm:$0xff] %v175_v51  ;;  %304 = vst [vmem:[#allocation5 + $0xc8] sm:$0xff] %v176_v52  ;;  %v181_v63 = vfloor.f32 %v53_v60  ;;  %v182_v0 = vfloor.f32 %v54_v61  ;;  %v56_v2 = vld [vmem:[#allocation2 + $0x108] sm:$0xff] }
  0x1e   :  { %305 = vst [vmem:[#allocation5 + $0xd0] sm:$0xff] %v177_v53  ;;  %v183_v1 = vfloor.f32 %v55_v62  ;;  %v57_v3 = vld [vmem:[#allocation2 + $0x110] sm:$0xff]  ;;  %v58_v4 = vld [vmem:[#allocation2 + $0x118] sm:$0xff]  ;;  %306 = vst [vmem:[#allocation5 + $0xd8] sm:$0xff] %v178_v57  ;;  %v184_v5 = vfloor.f32 %v56_v2 }
  0x1f   :  { %307 = vst [vmem:[#allocation5 + $0xe0] sm:$0xff] %v179_v58  ;;  %308 = vst [vmem:[#allocation5 + $0xe8] sm:$0xff] %v180_v59  ;;  %v185_v6 = vfloor.f32 %v57_v3  ;;  %v186_v7 = vfloor.f32 %v58_v4  ;;  %v59_v8 = vld [vmem:[#allocation2 + $0x120] sm:$0xff]  ;;  %v60_v9 = vld [vmem:[#allocation2 + $0x128] sm:$0xff] }
  0x20   :  { %v61_v10 = vld [vmem:[#allocation2 + $0x130] sm:$0xff]  ;;  %309 = vst [vmem:[#allocation5 + $0xf0] sm:$0xff] %v181_v63  ;;  %310 = vst [vmem:[#allocation5 + $0xf8] sm:$0xff] %v182_v0  ;;  %v187_v11 = vfloor.f32 %v59_v8  ;;  %v188_v12 = vfloor.f32 %v60_v9  ;;  %v62_v14 = vld [vmem:[#allocation2 + $0x138] sm:$0xff] }
  0x21   :  { %311 = vst [vmem:[#allocation5 + $0x100] sm:$0xff] %v183_v1  ;;  %v189_v13 = vfloor.f32 %v61_v10  ;;  %v63_v15 = vld [vmem:[#allocation2 + $0x140] sm:$0xff]  ;;  %v64_v16 = vld [vmem:[#allocation2 + $0x148] sm:$0xff]  ;;  %312 = vst [vmem:[#allocation5 + $0x108] sm:$0xff] %v184_v5  ;;  %v190_v17 = vfloor.f32 %v62_v14 }
  0x22   :  { %313 = vst [vmem:[#allocation5 + $0x110] sm:$0xff] %v185_v6  ;;  %314 = vst [vmem:[#allocation5 + $0x118] sm:$0xff] %v186_v7  ;;  %v191_v18 = vfloor.f32 %v63_v15  ;;  %v192_v19 = vfloor.f32 %v64_v16  ;;  %v65_v20 = vld [vmem:[#allocation2 + $0x150] sm:$0xff]  ;;  %v66_v21 = vld [vmem:[#allocation2 + $0x158] sm:$0xff] }
  0x23   :  { %v67_v22 = vld [vmem:[#allocation2 + $0x160] sm:$0xff]  ;;  %315 = vst [vmem:[#allocation5 + $0x120] sm:$0xff] %v187_v11  ;;  %316 = vst [vmem:[#allocation5 + $0x128] sm:$0xff] %v188_v12  ;;  %v193_v23 = vfloor.f32 %v65_v20  ;;  %v194_v24 = vfloor.f32 %v66_v21  ;;  %v68_v26 = vld [vmem:[#allocation2 + $0x168] sm:$0xff] }
  0x24   :  { %317 = vst [vmem:[#allocation5 + $0x130] sm:$0xff] %v189_v13  ;;  %v195_v25 = vfloor.f32 %v67_v22  ;;  %v69_v27 = vld [vmem:[#allocation2 + $0x170] sm:$0xff]  ;;  %v70_v28 = vld [vmem:[#allocation2 + $0x178] sm:$0xff]  ;;  %318 = vst [vmem:[#allocation5 + $0x138] sm:$0xff] %v190_v17  ;;  %v196_v29 = vfloor.f32 %v68_v26 }
  0x25   :  { %319 = vst [vmem:[#allocation5 + $0x140] sm:$0xff] %v191_v18  ;;  %320 = vst [vmem:[#allocation5 + $0x148] sm:$0xff] %v192_v19  ;;  %v197_v30 = vfloor.f32 %v69_v27  ;;  %v198_v31 = vfloor.f32 %v70_v28  ;;  %v71_v32 = vld [vmem:[#allocation2 + $0x180] sm:$0xff]  ;;  %v72_v33 = vld [vmem:[#allocation2 + $0x188] sm:$0xff] }
  0x26   :  { %v73_v34 = vld [vmem:[#allocation2 + $0x190] sm:$0xff]  ;;  %321 = vst [vmem:[#allocation5 + $0x150] sm:$0xff] %v193_v23  ;;  %322 = vst [vmem:[#allocation5 + $0x158] sm:$0xff] %v194_v24  ;;  %v199_v35 = vfloor.f32 %v71_v32  ;;  %v200_v36 = vfloor.f32 %v72_v33  ;;  %v74_v38 = vld [vmem:[#allocation2 + $0x198] sm:$0xff] }
  0x27   :  { %323 = vst [vmem:[#allocation5 + $0x160] sm:$0xff] %v195_v25  ;;  %v201_v37 = vfloor.f32 %v73_v34  ;;  %v75_v39 = vld [vmem:[#allocation2 + $0x1a0] sm:$0xff]  ;;  %v76_v40 = vld [vmem:[#allocation2 + $0x1a8] sm:$0xff]  ;;  %324 = vst [vmem:[#allocation5 + $0x168] sm:$0xff] %v196_v29  ;;  %v202_v41 = vfloor.f32 %v74_v38 }
  0x28   :  { %325 = vst [vmem:[#allocation5 + $0x170] sm:$0xff] %v197_v30  ;;  %326 = vst [vmem:[#allocation5 + $0x178] sm:$0xff] %v198_v31  ;;  %v203_v42 = vfloor.f32 %v75_v39  ;;  %v204_v43 = vfloor.f32 %v76_v40  ;;  %v77_v44 = vld [vmem:[#allocation2 + $0x1b0] sm:$0xff]  ;;  %v78_v45 = vld [vmem:[#allocation2 + $0x1b8] sm:$0xff] }
  0x29   :  { %v79_v46 = vld [vmem:[#allocation2 + $0x1c0] sm:$0xff]  ;;  %327 = vst [vmem:[#allocation5 + $0x180] sm:$0xff] %v199_v35  ;;  %328 = vst [vmem:[#allocation5 + $0x188] sm:$0xff] %v200_v36  ;;  %v205_v47 = vfloor.f32 %v77_v44  ;;  %v206_v48 = vfloor.f32 %v78_v45  ;;  %v80_v50 = vld [vmem:[#allocation2 + $0x1c8] sm:$0xff] }
  0x2a   :  { %329 = vst [vmem:[#allocation5 + $0x190] sm:$0xff] %v201_v37  ;;  %v207_v49 = vfloor.f32 %v79_v46  ;;  %v81_v51 = vld [vmem:[#allocation2 + $0x1d0] sm:$0xff]  ;;  %v82_v52 = vld [vmem:[#allocation2 + $0x1d8] sm:$0xff]  ;;  %330 = vst [vmem:[#allocation5 + $0x198] sm:$0xff] %v202_v41  ;;  %v208_v53 = vfloor.f32 %v80_v50 }
  0x2b   :  { %331 = vst [vmem:[#allocation5 + $0x1a0] sm:$0xff] %v203_v42  ;;  %332 = vst [vmem:[#allocation5 + $0x1a8] sm:$0xff] %v204_v43  ;;  %v209_v54 = vfloor.f32 %v81_v51  ;;  %v210_v55 = vfloor.f32 %v82_v52  ;;  %v83_v56 = vld [vmem:[#allocation2 + $0x1e0] sm:$0xff]  ;;  %v84_v57 = vld [vmem:[#allocation2 + $0x1e8] sm:$0xff] }
  0x2c   :  { %v85_v58 = vld [vmem:[#allocation2 + $0x1f0] sm:$0xff]  ;;  %333 = vst [vmem:[#allocation5 + $0x1b0] sm:$0xff] %v205_v47  ;;  %334 = vst [vmem:[#allocation5 + $0x1b8] sm:$0xff] %v206_v48  ;;  %v211_v59 = vfloor.f32 %v83_v56  ;;  %v212_v60 = vfloor.f32 %v84_v57  ;;  %v86_v62 = vld [vmem:[#allocation2 + $0x1f8] sm:$0xff] }
  0x2d   :  { %335 = vst [vmem:[#allocation5 + $0x1c0] sm:$0xff] %v207_v49  ;;  %v213_v61 = vfloor.f32 %v85_v58  ;;  %v87_v63 = vld [vmem:[#allocation2 + $0x200] sm:$0xff]  ;;  %v88_v0 = vld [vmem:[#allocation2 + $0x208] sm:$0xff]  ;;  %336 = vst [vmem:[#allocation5 + $0x1c8] sm:$0xff] %v208_v53  ;;  %v214_v1 = vfloor.f32 %v86_v62 }
  0x2e   :  { %337 = vst [vmem:[#allocation5 + $0x1d0] sm:$0xff] %v209_v54  ;;  %338 = vst [vmem:[#allocation5 + $0x1d8] sm:$0xff] %v210_v55  ;;  %v215_v2 = vfloor.f32 %v87_v63  ;;  %v216_v3 = vfloor.f32 %v88_v0  ;;  %v89_v4 = vld [vmem:[#allocation2 + $0x210] sm:$0xff]  ;;  %v90_v5 = vld [vmem:[#allocation2 + $0x218] sm:$0xff] }
  0x2f   :  { %v91_v6 = vld [vmem:[#allocation2 + $0x220] sm:$0xff]  ;;  %339 = vst [vmem:[#allocation5 + $0x1e0] sm:$0xff] %v211_v59  ;;  %340 = vst [vmem:[#allocation5 + $0x1e8] sm:$0xff] %v212_v60  ;;  %v217_v7 = vfloor.f32 %v89_v4  ;;  %v218_v8 = vfloor.f32 %v90_v5  ;;  %v92_v10 = vld [vmem:[#allocation2 + $0x228] sm:$0xff] }
  0x30   :  { %341 = vst [vmem:[#allocation5 + $0x1f0] sm:$0xff] %v213_v61  ;;  %v219_v9 = vfloor.f32 %v91_v6  ;;  %v93_v11 = vld [vmem:[#allocation2 + $0x230] sm:$0xff]  ;;  %v94_v12 = vld [vmem:[#allocation2 + $0x238] sm:$0xff]  ;;  %342 = vst [vmem:[#allocation5 + $0x1f8] sm:$0xff] %v214_v1  ;;  %v220_v13 = vfloor.f32 %v92_v10 }
  0x31   :  { %343 = vst [vmem:[#allocation5 + $0x200] sm:$0xff] %v215_v2  ;;  %344 = vst [vmem:[#allocation5 + $0x208] sm:$0xff] %v216_v3  ;;  %v221_v14 = vfloor.f32 %v93_v11  ;;  %v222_v15 = vfloor.f32 %v94_v12  ;;  %v95_v16 = vld [vmem:[#allocation2 + $0x240] sm:$0xff]  ;;  %v96_v17 = vld [vmem:[#allocation2 + $0x248] sm:$0xff] }
  0x32   :  { %v97_v18 = vld [vmem:[#allocation2 + $0x250] sm:$0xff]  ;;  %345 = vst [vmem:[#allocation5 + $0x210] sm:$0xff] %v217_v7  ;;  %346 = vst [vmem:[#allocation5 + $0x218] sm:$0xff] %v218_v8  ;;  %v223_v19 = vfloor.f32 %v95_v16  ;;  %v224_v20 = vfloor.f32 %v96_v17  ;;  %v98_v22 = vld [vmem:[#allocation2 + $0x258] sm:$0xff] }
  0x33   :  { %347 = vst [vmem:[#allocation5 + $0x220] sm:$0xff] %v219_v9  ;;  %v225_v21 = vfloor.f32 %v97_v18  ;;  %v99_v23 = vld [vmem:[#allocation2 + $0x260] sm:$0xff]  ;;  %v100_v24 = vld [vmem:[#allocation2 + $0x268] sm:$0xff]  ;;  %348 = vst [vmem:[#allocation5 + $0x228] sm:$0xff] %v220_v13  ;;  %v226_v25 = vfloor.f32 %v98_v22 }
  0x34   :  { %349 = vst [vmem:[#allocation5 + $0x230] sm:$0xff] %v221_v14  ;;  %350 = vst [vmem:[#allocation5 + $0x238] sm:$0xff] %v222_v15  ;;  %v227_v26 = vfloor.f32 %v99_v23  ;;  %v228_v27 = vfloor.f32 %v100_v24  ;;  %v101_v28 = vld [vmem:[#allocation2 + $0x270] sm:$0xff]  ;;  %v102_v29 = vld [vmem:[#allocation2 + $0x278] sm:$0xff] }
  0x35   :  { %v103_v30 = vld [vmem:[#allocation2 + $0x280] sm:$0xff]  ;;  %351 = vst [vmem:[#allocation5 + $0x240] sm:$0xff] %v223_v19  ;;  %352 = vst [vmem:[#allocation5 + $0x248] sm:$0xff] %v224_v20  ;;  %v229_v31 = vfloor.f32 %v101_v28  ;;  %v230_v32 = vfloor.f32 %v102_v29  ;;  %v104_v34 = vld [vmem:[#allocation2 + $0x288] sm:$0xff] }
  0x36   :  { %353 = vst [vmem:[#allocation5 + $0x250] sm:$0xff] %v225_v21  ;;  %v231_v33 = vfloor.f32 %v103_v30  ;;  %v105_v35 = vld [vmem:[#allocation2 + $0x290] sm:$0xff]  ;;  %v106_v36 = vld [vmem:[#allocation2 + $0x298] sm:$0xff]  ;;  %354 = vst [vmem:[#allocation5 + $0x258] sm:$0xff] %v226_v25  ;;  %v232_v37 = vfloor.f32 %v104_v34 }
  0x37   :  { %355 = vst [vmem:[#allocation5 + $0x260] sm:$0xff] %v227_v26  ;;  %356 = vst [vmem:[#allocation5 + $0x268] sm:$0xff] %v228_v27  ;;  %v233_v38 = vfloor.f32 %v105_v35  ;;  %v234_v39 = vfloor.f32 %v106_v36  ;;  %v107_v40 = vld [vmem:[#allocation2 + $0x2a0] sm:$0xff]  ;;  %v108_v41 = vld [vmem:[#allocation2 + $0x2a8] sm:$0xff] }
  0x38   :  { %v109_v42 = vld [vmem:[#allocation2 + $0x2b0] sm:$0xff]  ;;  %357 = vst [vmem:[#allocation5 + $0x270] sm:$0xff] %v229_v31  ;;  %358 = vst [vmem:[#allocation5 + $0x278] sm:$0xff] %v230_v32  ;;  %v235_v43 = vfloor.f32 %v107_v40  ;;  %v236_v44 = vfloor.f32 %v108_v41  ;;  %v110_v46 = vld [vmem:[#allocation2 + $0x2b8] sm:$0xff] }
  0x39   :  { %359 = vst [vmem:[#allocation5 + $0x280] sm:$0xff] %v231_v33  ;;  %v237_v45 = vfloor.f32 %v109_v42  ;;  %v111_v47 = vld [vmem:[#allocation2 + $0x2c0] sm:$0xff]  ;;  %v112_v48 = vld [vmem:[#allocation2 + $0x2c8] sm:$0xff]  ;;  %360 = vst [vmem:[#allocation5 + $0x288] sm:$0xff] %v232_v37  ;;  %v238_v49 = vfloor.f32 %v110_v46 }
  0x3a   :  { %361 = vst [vmem:[#allocation5 + $0x290] sm:$0xff] %v233_v38  ;;  %362 = vst [vmem:[#allocation5 + $0x298] sm:$0xff] %v234_v39  ;;  %v239_v50 = vfloor.f32 %v111_v47  ;;  %v240_v51 = vfloor.f32 %v112_v48  ;;  %v113_v52 = vld [vmem:[#allocation2 + $0x2d0] sm:$0xff]  ;;  %v114_v53 = vld [vmem:[#allocation2 + $0x2d8] sm:$0xff] }
  0x3b   :  { %v115_v54 = vld [vmem:[#allocation2 + $0x2e0] sm:$0xff]  ;;  %363 = vst [vmem:[#allocation5 + $0x2a0] sm:$0xff] %v235_v43  ;;  %364 = vst [vmem:[#allocation5 + $0x2a8] sm:$0xff] %v236_v44  ;;  %v241_v55 = vfloor.f32 %v113_v52  ;;  %v242_v56 = vfloor.f32 %v114_v53  ;;  %v116_v58 = vld [vmem:[#allocation2 + $0x2e8] sm:$0xff] }
  0x3c   :  { %365 = vst [vmem:[#allocation5 + $0x2b0] sm:$0xff] %v237_v45  ;;  %v243_v57 = vfloor.f32 %v115_v54  ;;  %v117_v59 = vld [vmem:[#allocation2 + $0x2f0] sm:$0xff]  ;;  %v118_v60 = vld [vmem:[#allocation2 + $0x2f8] sm:$0xff]  ;;  %366 = vst [vmem:[#allocation5 + $0x2b8] sm:$0xff] %v238_v49  ;;  %v244_v61 = vfloor.f32 %v116_v58 }
  0x3d   :  { %367 = vst [vmem:[#allocation5 + $0x2c0] sm:$0xff] %v239_v50  ;;  %368 = vst [vmem:[#allocation5 + $0x2c8] sm:$0xff] %v240_v51  ;;  %v245_v62 = vfloor.f32 %v117_v59  ;;  %v246_v63 = vfloor.f32 %v118_v60  ;;  %v119_v0 = vld [vmem:[#allocation2 + $0x300] sm:$0xff]  ;;  %v120_v1 = vld [vmem:[#allocation2 + $0x308] sm:$0xff] }
  0x3e   :  { %v121_v2 = vld [vmem:[#allocation2 + $0x310] sm:$0xff]  ;;  %369 = vst [vmem:[#allocation5 + $0x2d0] sm:$0xff] %v241_v55  ;;  %370 = vst [vmem:[#allocation5 + $0x2d8] sm:$0xff] %v242_v56  ;;  %v247_v3 = vfloor.f32 %v119_v0  ;;  %v248_v4 = vfloor.f32 %v120_v1  ;;  %v122_v6 = vld [vmem:[#allocation2 + $0x318] sm:$0xff] }
  0x3f   :  { %371 = vst [vmem:[#allocation5 + $0x2e0] sm:$0xff] %v243_v57  ;;  %v249_v5 = vfloor.f32 %v121_v2  ;;  %v123_v7 = vld [vmem:[#allocation2 + $0x320] sm:$0xff]  ;;  %v124_v8 = vld [vmem:[#allocation2 + $0x328] sm:$0xff]  ;;  %372 = vst [vmem:[#allocation5 + $0x2e8] sm:$0xff] %v244_v61  ;;  %v250_v9 = vfloor.f32 %v122_v6 }
  0x40   :  { %373 = vst [vmem:[#allocation5 + $0x2f0] sm:$0xff] %v245_v62  ;;  %374 = vst [vmem:[#allocation5 + $0x2f8] sm:$0xff] %v246_v63  ;;  %v251_v10 = vfloor.f32 %v123_v7  ;;  %v252_v11 = vfloor.f32 %v124_v8  ;;  %v125_v12 = vld [vmem:[#allocation2 + $0x330] sm:$0xff]  ;;  %v126_v13 = vld [vmem:[#allocation2 + $0x338] sm:$0xff] }
  0x41   :  { %v127_v14 = vld [vmem:[#allocation2 + $0x340] sm:$0xff]  ;;  %375 = vst [vmem:[#allocation5 + $0x300] sm:$0xff] %v247_v3  ;;  %376 = vst [vmem:[#allocation5 + $0x308] sm:$0xff] %v248_v4  ;;  %v253_v15 = vfloor.f32 %v125_v12  ;;  %v254_v16 = vfloor.f32 %v126_v13  ;;  %v128_v18 = vld [vmem:[#allocation2 + $0x348] sm:$0xff] }
  0x42   :  { %377 = vst [vmem:[#allocation5 + $0x310] sm:$0xff] %v249_v5  ;;  %v255_v17 = vfloor.f32 %v127_v14  ;;  %v129_v19 = vld [vmem:[#allocation2 + $0x350] sm:$0xff]  ;;  %v130_v20 = vld [vmem:[#allocation2 + $0x358] sm:$0xff]  ;;  %378 = vst [vmem:[#allocation5 + $0x318] sm:$0xff] %v250_v9  ;;  %v256_v21 = vfloor.f32 %v128_v18 }
  0x43   :  { %379 = vst [vmem:[#allocation5 + $0x320] sm:$0xff] %v251_v10  ;;  %380 = vst [vmem:[#allocation5 + $0x328] sm:$0xff] %v252_v11  ;;  %v257_v22 = vfloor.f32 %v129_v19  ;;  %v258_v23 = vfloor.f32 %v130_v20  ;;  %v131_v24 = vld [vmem:[#allocation2 + $0x360] sm:$0xff]  ;;  %v132_v25 = vld [vmem:[#allocation2 + $0x368] sm:$0xff] }
  0x44   :  { %v133_v26 = vld [vmem:[#allocation2 + $0x370] sm:$0xff]  ;;  %381 = vst [vmem:[#allocation5 + $0x330] sm:$0xff] %v253_v15  ;;  %382 = vst [vmem:[#allocation5 + $0x338] sm:$0xff] %v254_v16  ;;  %v259_v27 = vfloor.f32 %v131_v24  ;;  %v260_v28 = vfloor.f32 %v132_v25  ;;  %v134_v30 = vld [vmem:[#allocation2 + $0x378] sm:$0xff] }
  0x45   :  { %383 = vst [vmem:[#allocation5 + $0x340] sm:$0xff] %v255_v17  ;;  %v261_v29 = vfloor.f32 %v133_v26  ;;  %v135_v31 = vld [vmem:[#allocation2 + $0x380] sm:$0xff]  ;;  %v136_v32 = vld [vmem:[#allocation2 + $0x388] sm:$0xff]  ;;  %384 = vst [vmem:[#allocation5 + $0x348] sm:$0xff] %v256_v21  ;;  %v262_v33 = vfloor.f32 %v134_v30 }
  0x46   :  { %385 = vst [vmem:[#allocation5 + $0x350] sm:$0xff] %v257_v22  ;;  %386 = vst [vmem:[#allocation5 + $0x358] sm:$0xff] %v258_v23  ;;  %v263_v34 = vfloor.f32 %v135_v31  ;;  %v264_v35 = vfloor.f32 %v136_v32  ;;  %v137_v36 = vld [vmem:[#allocation2 + $0x390] sm:$0xff]  ;;  %v138_v37 = vld [vmem:[#allocation2 + $0x398] sm:$0xff] }
  0x47   :  { %v139_v38 = vld [vmem:[#allocation2 + $0x3a0] sm:$0xff]  ;;  %387 = vst [vmem:[#allocation5 + $0x360] sm:$0xff] %v259_v27  ;;  %388 = vst [vmem:[#allocation5 + $0x368] sm:$0xff] %v260_v28  ;;  %v265_v39 = vfloor.f32 %v137_v36  ;;  %v266_v40 = vfloor.f32 %v138_v37  ;;  %v140_v42 = vld [vmem:[#allocation2 + $0x3a8] sm:$0xff] }
  0x48   :  { %389 = vst [vmem:[#allocation5 + $0x370] sm:$0xff] %v261_v29  ;;  %v267_v41 = vfloor.f32 %v139_v38  ;;  %v141_v43 = vld [vmem:[#allocation2 + $0x3b0] sm:$0xff]  ;;  %v142_v44 = vld [vmem:[#allocation2 + $0x3b8] sm:$0xff]  ;;  %390 = vst [vmem:[#allocation5 + $0x378] sm:$0xff] %v262_v33  ;;  %v268_v45 = vfloor.f32 %v140_v42 }
  0x49   :  { %391 = vst [vmem:[#allocation5 + $0x380] sm:$0xff] %v263_v34  ;;  %392 = vst [vmem:[#allocation5 + $0x388] sm:$0xff] %v264_v35  ;;  %v269_v46 = vfloor.f32 %v141_v43  ;;  %v270_v47 = vfloor.f32 %v142_v44  ;;  %v143_v48 = vld [vmem:[#allocation2 + $0x3c0] sm:$0xff]  ;;  %v144_v49 = vld [vmem:[#allocation2 + $0x3c8] sm:$0xff] }
  0x4a   :  { %v145_v50 = vld [vmem:[#allocation2 + $0x3d0] sm:$0xff]  ;;  %393 = vst [vmem:[#allocation5 + $0x390] sm:$0xff] %v265_v39  ;;  %394 = vst [vmem:[#allocation5 + $0x398] sm:$0xff] %v266_v40  ;;  %v271_v51 = vfloor.f32 %v143_v48  ;;  %v272_v52 = vfloor.f32 %v144_v49  ;;  %v146_v54 = vld [vmem:[#allocation2 + $0x3d8] sm:$0xff] }
  0x4b   :  { %395 = vst [vmem:[#allocation5 + $0x3a0] sm:$0xff] %v267_v41  ;;  %v273_v53 = vfloor.f32 %v145_v50  ;;  %v147_v55 = vld [vmem:[#allocation2 + $0x3e0] sm:$0xff]  ;;  %v148_v56 = vld [vmem:[#allocation2 + $0x3e8] sm:$0xff]  ;;  %396 = vst [vmem:[#allocation5 + $0x3a8] sm:$0xff] %v268_v45  ;;  %v274_v57 = vfloor.f32 %v146_v54 }
  0x4c   :  { %397 = vst [vmem:[#allocation5 + $0x3b0] sm:$0xff] %v269_v46  ;;  %398 = vst [vmem:[#allocation5 + $0x3b8] sm:$0xff] %v270_v47  ;;  %v275_v58 = vfloor.f32 %v147_v55  ;;  %v276_v59 = vfloor.f32 %v148_v56  ;;  %v149_v60 = vld [vmem:[#allocation2 + $0x3f0] sm:$0xff]  ;;  %v150_v61 = vld [vmem:[#allocation2 + $0x3f8] sm:$0xff] }
  0x4d   :  { %399 = vst [vmem:[#allocation5 + $0x3c0] sm:$0xff] %v271_v51  ;;  %400 = vst [vmem:[#allocation5 + $0x3c8] sm:$0xff] %v272_v52  ;;  %v277_v62 = vfloor.f32 %v149_v60  ;;  %v278_v63 = vfloor.f32 %v150_v61 }
  0x4e   :  { %401 = vst [vmem:[#allocation5 + $0x3d0] sm:$0xff] %v273_v53  ;;  %402 = vst [vmem:[#allocation5 + $0x3d8] sm:$0xff] %v274_v57 }
  0x4f   :  { %403 = vst [vmem:[#allocation5 + $0x3e0] sm:$0xff] %v275_v58  ;;  %404 = vst [vmem:[#allocation5 + $0x3e8] sm:$0xff] %v276_v59 }
  0x50   :  { %405 = vst [vmem:[#allocation5 + $0x3f0] sm:$0xff] %v277_v62  ;;  %406 = vst [vmem:[#allocation5 + $0x3f8] sm:$0xff] %v278_v63 }
  0x51   :  { %459 = shalt.err (!%p456_p9)
}
  0x52   :  { %418 = dma.vmem_to_hbm [thread:$0]  %s413_s13, 16384, %s499_s1, [#allocation4], %s473_s9, %s473_s9, %s474_s10  }
  0x53   :  { %470 = dma.done.wait [#allocation4], 16384  }
  0x54   :  { %471 = vsyncadd [#allocation4], 4294950912 }
  0x55   :  { %422 = vsyncpa [#allocation3], 1 }
  0x56   :  { %423 = vsyncpa [#allocation4], 1 }

</bundles_post_ra>
